<compile_context>
chip_gen: v5e
topology: v5e:2x2
jax: 0.10.0
libtpu: 0.0.40
codegen_flags: <defaults>
</compile_context>

<pallas_src>
import functools

import jax
import jax.numpy as jnp
from jax import lax
from jax.experimental import pallas as pl
from jax.experimental.pallas import tpu as pltpu


DROPOUT_P = 0.2          # nn.Dropout(dropout_p=0.2)
_NEG_BIG = -1e30         # finite stand-in for -inf (avoids NaN on fully-masked rows)


def _sdpa_kernel(q_ref, k_ref, v_ref, mask_ref, keep_ref, out_ref, attn_ref,
                 *, scale, inv_keep, apply_dropout):
    # q_ref: (TQ, D), k_ref/v_ref: (S, D), mask_ref/keep_ref: (TQ, S) int8
    q = q_ref[...] * scale          # fold 1/sqrt(d_k) into Q (S*D work, not S*S)
    k = k_ref[...]
    v = v_ref[...]

    # scores = q @ k^T, contracted over D, f32 accumulation on the MXU.
    scores = lax.dot_general(
        q, k, (((1,), (1,)), ((), ())),
        preferred_element_type=jnp.float32)              # (TQ, S) f32

    # masked_fill(mask == 0, -inf)  -- finite sentinel, see header note.
    invalid = mask_ref[...].astype(jnp.int32) == 0
    scores = jnp.where(invalid, _NEG_BIG, scores)

    # numerically-stable softmax along the key axis.
    m = jnp.max(scores, axis=-1, keepdims=True)
    e = jnp.exp(scores - m)
    inv_l = 1.0 / jnp.sum(e, axis=-1, keepdims=True)     # reciprocal on (TQ, 1)
    attn = e * inv_l                                     # multiply on (TQ, S)

    # Inverted dropout with a precomputed keep mask; scale folded into the select.
    if apply_dropout:
        kept = keep_ref[...].astype(jnp.int32) != 0
        attn = jnp.where(kept, attn * inv_keep, 0.0)

    attn_ref[...] = attn.astype(attn_ref.dtype)

    # output = attn @ V  (attn cast to V's dtype so bf16 inputs stay on the bf16 MXU path)
    out = jnp.dot(attn.astype(v.dtype), v, preferred_element_type=jnp.float32)
    out_ref[...] = out.astype(out_ref.dtype)


def scaled_dot_product_attention(Q, K, V, mask=None, *, dropout_p=DROPOUT_P,
                                 dropout_key=None, block_q=128):
    assert Q.ndim == 3 and K.ndim == 3 and V.ndim == 3
    assert Q.shape == K.shape == V.shape
    B, S, D = Q.shape

    if mask is None:
        mask8 = jnp.ones((B, S, S), dtype=jnp.int8)
    else:
        assert mask.ndim == 3 and mask.shape == (B, S, S)
        mask8 = (mask != 0).astype(jnp.int8)

    apply_dropout = float(dropout_p) > 0.0
    if apply_dropout:
        if dropout_key is None:
            dropout_key = jax.random.PRNGKey(0)
        # TODO(synk): PyTorch's dropout RNG stream cannot be reproduced
        # bit-exactly; we keep the same keep-probability / inverted-dropout
        # scaling semantics using jax.random.
        keep8 = jax.random.bernoulli(
            dropout_key, 1.0 - float(dropout_p), (B, S, S)).astype(jnp.int8)
        inv_keep = 1.0 / (1.0 - float(dropout_p))
    else:
        keep8 = jnp.ones((B, S, S), dtype=jnp.int8)
        inv_keep = 1.0

    # Query tile: full S for short sequences, 128-row tiles otherwise. Keeps the
    # per-step VMEM footprint (scores/attn (TQ,S), K/V (S,D), int8 masks) small
    # enough for default scoped VMEM on v5e/v6e/v7x at moderate S.
    tq = S if S <= block_q else block_q
    assert S % tq == 0, "sequence length must be a multiple of the query tile"
    num_q = S // tq

    kernel = functools.partial(
        _sdpa_kernel,
        scale=float(D) ** -0.5,
        inv_keep=float(inv_keep),
        apply_dropout=apply_dropout)

    grid_spec = pl.GridSpec(
        grid=(B, num_q),
        in_specs=[
            pl.BlockSpec((None, tq, D), lambda b, qi: (b, qi, 0)),   # Q tile
            pl.BlockSpec((None, S, D), lambda b, qi: (b, 0, 0)),     # K (full S)
            pl.BlockSpec((None, S, D), lambda b, qi: (b, 0, 0)),     # V (full S)
            pl.BlockSpec((None, tq, S), lambda b, qi: (b, qi, 0)),   # mask tile (int8)
            pl.BlockSpec((None, tq, S), lambda b, qi: (b, qi, 0)),   # keep tile (int8)
        ],
        out_specs=[
            pl.BlockSpec((None, tq, D), lambda b, qi: (b, qi, 0)),   # output tile
            pl.BlockSpec((None, tq, S), lambda b, qi: (b, qi, 0)),   # attention tile
        ],
    )

    out, attn = pl.pallas_call(
        kernel,
        out_shape=(
            jax.ShapeDtypeStruct((B, S, D), Q.dtype),
            jax.ShapeDtypeStruct((B, S, S), Q.dtype),
        ),
        grid_spec=grid_spec,
        compiler_params=pltpu.CompilerParams(
            dimension_semantics=("parallel", "parallel")),
    )(Q, K, V, mask8, keep8)
    return out, attn


if __name__ == "__main__":
    key = jax.random.PRNGKey(0)
    kq, kk, kv, kd = jax.random.split(key, 4)

    B, S, D = 2, 8, 32
    Q = jax.random.normal(kq, (B, S, D), dtype=jnp.float32)
    K = jax.random.normal(kk, (B, S, D), dtype=jnp.float32)
    V = jax.random.normal(kv, (B, S, D), dtype=jnp.float32)

    # causal mask, shape (B, S, S); 0 means masked out
    mask = jnp.tril(jnp.ones((S, S), dtype=jnp.int32))[None].repeat(B, axis=0)

    # 1) default forward (dropout active, like the train-mode PyTorch module)
    out, attn = scaled_dot_product_attention(Q, K, V, mask, dropout_key=kd)
    jax.block_until_ready((out, attn))
    assert out.shape == (B, S, D)
    assert attn.shape == (B, S, S)
    assert bool(jnp.all(jnp.isfinite(out)))
    assert bool(jnp.all(jnp.isfinite(attn)))

    # 2) dropout disabled: compare against a pure-JAX reference
    out0, attn0 = scaled_dot_product_attention(Q, K, V, mask, dropout_p=0.0)
    jax.block_until_ready((out0, attn0))
    scores_ref = jnp.einsum('bqd,bkd->bqk', Q, K) / (float(D) ** 0.5)
    scores_ref = jnp.where(mask == 0, -jnp.inf, scores_ref)
    attn_ref = jax.nn.softmax(scores_ref, axis=-1)
    out_ref = jnp.einsum('bqk,bkd->bqd', attn_ref, V)
    assert bool(jnp.allclose(attn0, attn_ref, atol=1e-5, rtol=1e-5))
    assert bool(jnp.allclose(out0, out_ref, atol=1e-5, rtol=1e-5))

    print("KERNEL_OK")
</pallas_src>

<mosaic_0001>
module attributes {stable_mosaic.version = 11 : i64} {
  func.func @_sdpa_kernel(%arg0: i32, %arg1: i32, %arg2: memref<1x8x32xf32, #tpu.memory_space<vmem>>, %arg3: memref<1x8x32xf32, #tpu.memory_space<vmem>>, %arg4: memref<1x8x32xf32, #tpu.memory_space<vmem>>, %arg5: memref<1x8x8xi8, #tpu.memory_space<vmem>>, %arg6: memref<1x8x8xi8, #tpu.memory_space<vmem>>, %arg7: memref<1x8x32xf32, #tpu.memory_space<vmem>>, %arg8: memref<1x8x8xf32, #tpu.memory_space<vmem>>) attributes {dimension_semantics = [#tpu.dimension_semantics<parallel>, #tpu.dimension_semantics<parallel>], iteration_bounds = array<i64: 2, 1>, scalar_prefetch = 0 : i64, scratch_operands = 0 : i64, tpu.core_type = #tpu.core_type<tc>, window_params = [{transform_indices = @transform_0, window_bounds = array<i64: 1, 8, 32>}, {transform_indices = @transform_1, window_bounds = array<i64: 1, 8, 32>}, {transform_indices = @transform_2, window_bounds = array<i64: 1, 8, 32>}, {transform_indices = @transform_3, window_bounds = array<i64: 1, 8, 8>}, {transform_indices = @transform_4, window_bounds = array<i64: 1, 8, 8>}, {transform_indices = @transform_5, window_bounds = array<i64: 1, 8, 32>}, {transform_indices = @transform_6, window_bounds = array<i64: 1, 8, 8>}]} {
    %c0 = arith.constant 0 : index
    %c0_0 = arith.constant 0 : index
    %c0_1 = arith.constant 0 : index
    %0 = vector.load %arg2[%c0, %c0_0, %c0_1] : memref<1x8x32xf32, #tpu.memory_space<vmem>>, vector<1x8x32xf32>
    %1 = vector.shape_cast %0 : vector<1x8x32xf32> to vector<8x32xf32>
    %cst = arith.constant 0.176776692 : f32
    %2 = vector.broadcast %cst : f32 to vector<8x32xf32>
    %3 = arith.mulf %1, %2 : vector<8x32xf32>
    %c0_2 = arith.constant 0 : index
    %c0_3 = arith.constant 0 : index
    %c0_4 = arith.constant 0 : index
    %4 = vector.load %arg3[%c0_2, %c0_3, %c0_4] : memref<1x8x32xf32, #tpu.memory_space<vmem>>, vector<1x8x32xf32>
    %5 = vector.shape_cast %4 : vector<1x8x32xf32> to vector<8x32xf32>
    %c0_5 = arith.constant 0 : index
    %c0_6 = arith.constant 0 : index
    %c0_7 = arith.constant 0 : index
    %6 = vector.load %arg4[%c0_5, %c0_6, %c0_7] : memref<1x8x32xf32, #tpu.memory_space<vmem>>, vector<1x8x32xf32>
    %7 = vector.shape_cast %6 : vector<1x8x32xf32> to vector<8x32xf32>
    %cst_8 = arith.constant dense<0.000000e+00> : vector<8x8xf32>
    %8 = tpu.matmul %3, %5, %cst_8 {dimension_numbers = #tpu.dot_dimension_numbers<[1], [1], [0], [0], [0, 0, 1, 0], [], []>} : vector<8x32xf32>, vector<8x32xf32>, vector<8x8xf32> -> vector<8x8xf32>
    %c0_9 = arith.constant 0 : index
    %c0_10 = arith.constant 0 : index
    %c0_11 = arith.constant 0 : index
    %9 = vector.load %arg5[%c0_9, %c0_10, %c0_11] : memref<1x8x8xi8, #tpu.memory_space<vmem>>, vector<1x8x8xi8>
    %10 = vector.shape_cast %9 : vector<1x8x8xi8> to vector<8x8xi8>
    %11 = arith.extsi %10 : vector<8x8xi8> to vector<8x8xi32>
    %c0_i32 = arith.constant 0 : i32
    %12 = vector.broadcast %c0_i32 : i32 to vector<8x8xi32>
    %13 = arith.cmpi eq, %11, %12 : vector<8x8xi32>
    %cst_12 = arith.constant -1.000000e+30 : f32
    %14 = vector.broadcast %cst_12 : f32 to vector<8x8xf32>
    %15 = arith.select %13, %14, %8 : vector<8x8xi1>, vector<8x8xf32>
    %cst_13 = arith.constant dense<0xFF800000> : vector<8xf32>
    %16 = vector.multi_reduction <maximumf>, %15, %cst_13 [1] : vector<8x8xf32> to vector<8xf32>
    %17 = vector.shape_cast %16 : vector<8xf32> to vector<8x1xf32>
    %18 = vector.broadcast %17 : vector<8x1xf32> to vector<8x8xf32>
    %19 = arith.subf %15, %18 : vector<8x8xf32>
    %20 = math.exp %19 : vector<8x8xf32>
    %cst_14 = arith.constant dense<0.000000e+00> : vector<8xf32>
    %21 = vector.multi_reduction <add>, %20, %cst_14 [1] : vector<8x8xf32> to vector<8xf32>
    %22 = vector.shape_cast %21 : vector<8xf32> to vector<8x1xf32>
    %cst_15 = arith.constant 1.000000e+00 : f32
    %23 = vector.broadcast %cst_15 : f32 to vector<8x1xf32>
    %24 = arith.divf %23, %22 : vector<8x1xf32>
    %25 = vector.broadcast %24 : vector<8x1xf32> to vector<8x8xf32>
    %26 = arith.mulf %20, %25 : vector<8x8xf32>
    %c0_16 = arith.constant 0 : index
    %c0_17 = arith.constant 0 : index
    %c0_18 = arith.constant 0 : index
    %27 = vector.load %arg6[%c0_16, %c0_17, %c0_18] : memref<1x8x8xi8, #tpu.memory_space<vmem>>, vector<1x8x8xi8>
    %28 = vector.shape_cast %27 : vector<1x8x8xi8> to vector<8x8xi8>
    %29 = arith.extsi %28 : vector<8x8xi8> to vector<8x8xi32>
    %c0_i32_19 = arith.constant 0 : i32
    %30 = vector.broadcast %c0_i32_19 : i32 to vector<8x8xi32>
    %31 = arith.cmpi ne, %29, %30 : vector<8x8xi32>
    %cst_20 = arith.constant 1.250000e+00 : f32
    %32 = vector.broadcast %cst_20 : f32 to vector<8x8xf32>
    %33 = arith.mulf %26, %32 : vector<8x8xf32>
    %cst_21 = arith.constant 0.000000e+00 : f32
    %34 = vector.broadcast %cst_21 : f32 to vector<8x8xf32>
    %35 = arith.select %31, %33, %34 : vector<8x8xi1>, vector<8x8xf32>
    %c0_22 = arith.constant 0 : index
    %c0_23 = arith.constant 0 : index
    %c0_24 = arith.constant 0 : index
    %36 = vector.load %arg8[%c0_22, %c0_23, %c0_24] : memref<1x8x8xf32, #tpu.memory_space<vmem>>, vector<1x8x8xf32>
    %37 = vector.shape_cast %36 : vector<1x8x8xf32> to vector<8x8xf32>
    %38 = vector.shape_cast %35 : vector<8x8xf32> to vector<1x8x8xf32>
    tpu.vector_store %arg8[%c0_22, %c0_23, %c0_24], %38 {strides = array<i32>} : memref<1x8x8xf32, #tpu.memory_space<vmem>>, vector<1x8x8xf32>,
    %cst_25 = arith.constant dense<0.000000e+00> : vector<8x32xf32>
    %39 = tpu.matmul %35, %7, %cst_25 {dimension_numbers = #tpu.dot_dimension_numbers<[1], [0], [0], [1], [0, 0, 1, 1], [], []>} : vector<8x8xf32>, vector<8x32xf32>, vector<8x32xf32> -> vector<8x32xf32>
    %c0_26 = arith.constant 0 : index
    %c0_27 = arith.constant 0 : index
    %c0_28 = arith.constant 0 : index
    %40 = vector.load %arg7[%c0_26, %c0_27, %c0_28] : memref<1x8x32xf32, #tpu.memory_space<vmem>>, vector<1x8x32xf32>
    %41 = vector.shape_cast %40 : vector<1x8x32xf32> to vector<8x32xf32>
    %42 = vector.shape_cast %39 : vector<8x32xf32> to vector<1x8x32xf32>
    tpu.vector_store %arg7[%c0_26, %c0_27, %c0_28], %42 {strides = array<i32>} : memref<1x8x32xf32, #tpu.memory_space<vmem>>, vector<1x8x32xf32>,
    return
  }
  func.func @transform_0(%arg0: i32, %arg1: i32) -> (i32, i32, i32) {
    %c0_i32 = arith.constant 0 : i32
    %c0_i32_0 = arith.constant 0 : i32
    return %arg0, %arg1, %c0_i32 : i32, i32, i32
  }
  func.func @transform_1(%arg0: i32, %arg1: i32) -> (i32, i32, i32) {
    %c0_i32 = arith.constant 0 : i32
    %c0_i32_0 = arith.constant 0 : i32
    %c0_i32_1 = arith.constant 0 : i32
    return %arg0, %c0_i32, %c0_i32_0 : i32, i32, i32
  }
  func.func @transform_2(%arg0: i32, %arg1: i32) -> (i32, i32, i32) {
    %c0_i32 = arith.constant 0 : i32
    %c0_i32_0 = arith.constant 0 : i32
    %c0_i32_1 = arith.constant 0 : i32
    return %arg0, %c0_i32, %c0_i32_0 : i32, i32, i32
  }
  func.func @transform_3(%arg0: i32, %arg1: i32) -> (i32, i32, i32) {
    %c0_i32 = arith.constant 0 : i32
    %c0_i32_0 = arith.constant 0 : i32
    return %arg0, %arg1, %c0_i32 : i32, i32, i32
  }
  func.func @transform_4(%arg0: i32, %arg1: i32) -> (i32, i32, i32) {
    %c0_i32 = arith.constant 0 : i32
    %c0_i32_0 = arith.constant 0 : i32
    return %arg0, %arg1, %c0_i32 : i32, i32, i32
  }
  func.func @transform_5(%arg0: i32, %arg1: i32) -> (i32, i32, i32) {
    %c0_i32 = arith.constant 0 : i32
    %c0_i32_0 = arith.constant 0 : i32
    return %arg0, %arg1, %c0_i32 : i32, i32, i32
  }
  func.func @transform_6(%arg0: i32, %arg1: i32) -> (i32, i32, i32) {
    %c0_i32 = arith.constant 0 : i32
    %c0_i32_0 = arith.constant 0 : i32
    return %arg0, %arg1, %c0_i32 : i32, i32, i32
  }
}

</mosaic_0001>

<bundles_post_ra>
// kernel: tpu_custom_call.1
= control target key start
LH: loop header
LB: loop body
LE: loop exit
PB: predicated region body
PF: predicated region fallthrough
CT: control target
= control target key end

     0   :  { %s1439_s0 = inlined_call_operand.hbm [shape: f32[2,8,32], index: 0, kind: input, shape index: {}]   ;;  %s1440_s1 = inlined_call_operand.hbm [shape: f32[2,8,32], index: 1, kind: input, shape index: {}]   ;;  %s1441_s2 = inlined_call_operand.hbm [shape: f32[2,8,32], index: 2, kind: input, shape index: {}]   ;;  %s1442_s3 = inlined_call_operand.hbm [shape: s8[2,8,8], index: 3, kind: input, shape index: {}]   ;;  %s1443_s4 = inlined_call_operand.hbm [shape: s8[2,8,8], index: 4, kind: input, shape index: {}]   ;;  %s1444_s5 = inlined_call_operand.hbm [shape: f32[2,8,32], index: 5, kind: output, shape index: {0}]   ;;  %s1445_s6 = inlined_call_operand.hbm [shape: f32[2,8,8], index: 6, kind: output, shape index: {1}]  }
   0x1   :  { %1454 = sst [smem:[#allocation26_spill]] %s1440_s1 }
   0x2   :  { %1455 = sst [smem:[#allocation27_spill]] %s1442_s3 }
   0x3   :  { %12 = vsyncpa [#allocation3], 0 }
   0x4   :  { %14 = vsyncpa [#allocation3 + $0x1], 0 }
   0x5   :  { %15 = vsyncpa [#allocation6], 0 }
   0x6   :  { %17 = vsyncpa [#allocation6 + $0x1], 0 }
   0x7   :  { %18 = vsyncpa [#allocation9], 0 }
   0x8   :  { %20 = vsyncpa [#allocation9 + $0x1], 0 }
   0x9   :  { %21 = vsyncpa [#allocation4], 0 }
   0xa   :  { %23 = vsyncpa [#allocation4 + $0x1], 0 }
   0xb   :  { %24 = vsyncpa [#allocation13], 0 }
   0xc   :  { %26 = vsyncpa [#allocation13 + $0x1], 0  ;;  %s1216_s21 = smov 0   ;;  %s1218_s22 = smov 0  }
   0xd   :  { %s1220_s23 = smov 0   ;;  %s1222_s24 = smov 0  }
   0xe   :  { %s1224_s25 = smov 0   ;;  %s1226_s26 = smov 0  }
   0xf LB: > { %1456 = sst [smem:[#allocation19_spill]] %s1159_s21  ;;  %s1247_s27 = sadd.s32 4294967295, %s1179_s26   ;;  %s1179_s26 = sphi %s1226_s26, %s32_s26   ;;  %s1175_s25 = sphi %s1224_s25, %s1478_s25   ;;  %s1171_s24 = sphi %s1222_s24, %s1477_s24   ;;  %s1167_s23 = sphi %s1220_s23, %s1476_s23   ;;  %s1163_s22 = sphi %s1218_s22, %s1480_s22   ;;  %s1159_s21 = sphi %s1216_s21, %s1479_s21  }
  0x10   : > { %1457 = sst [smem:[#allocation20_spill]] %s1167_s23  ;;  %s786_s28 = sadd.s32 4294967294, %s1179_s26  }
  0x11   : > { %1458 = sst [smem:[#allocation21_spill]] %s1175_s25  ;;  %s44_s29 = sadd.s32 1, %s1175_s25 }
  0x12   : > { %1459 = sst [smem:[#allocation22_spill]] %s1179_s26  ;;  %s53_s30 = sadd.s32 1, %s1167_s23 }
  0x13   : > { %p46_p0 = scmp.ge.s32.totalorder %s44_s29, 2  ;;  %p60_p1 = scmp.ne.s32.totalorder %s1167_s23, %s1163_s22 }
  0x14   : > { %p61_p2 = scmp.eq.s32.totalorder %s1179_s26, 0  ;;  %p66_p3 = scmp.ne.s32.totalorder %s1163_s22, %s1159_s21 }
  0x15   : > { %s1482_s29 = smov (%p46_p0, %s44_s29), 0  ;;  %p67_p5 = scmp.eq.s32.totalorder %s1247_s27, 0 }
  0x16   : > { %1460 = sst [smem:[#allocation23_spill]] %s1482_s29  ;;  %p1259_p4 = por %p61_p2, %p60_p1 }
  0x17   : > { %s48_s8 = ssub.s32 %s1175_s25, %s1482_s29  ;;  %p200_p6 = scmp.eq.s32.totalorder %s1247_s27, 1 }
  0x18   : > { %p51_p7 = scmp.eq.s32.totalorder %s48_s8, 0  ;;  %p1267_p8 = por %p67_p5, %p66_p3 }
  0x19   : > { %p1271_p9 = por %p200_p6, %p60_p1  ;;  %p206_p10 = scmp.eq.s32.totalorder %s786_s28, 1 }
  0x1a   : > { %s1276_s11 = scalar_select %p51_p7, %s1167_s23, %s53_s30  }
  0x1b   : > { %p1278_p11 = por %p206_p10, %p66_p3  ;;  %p788_p12 = scmp.ge.s32.totalorder %s1179_s26, 2 }
  0x1c   : > { %1464 = sst [smem:[#allocation24_spill]] %s1276_s11  ;;  %p853_p13 = scmp.lt.s32.totalorder %s1179_s26, 2 }
  0x1d   : > { %s1465_s12 = scalar_select %p1278_p11, 1, 0 }
  0x1e   : > { %s1285_s13 = sand.u32 1, %s1167_s23   ;;  %s1291_s15 = sshll.u32 %s1175_s25, 3 }
  0x1f   : > { %1466 = sst [smem:[#allocation25_spill]] %s1465_s12  ;;  %s1288_s14 = sshll.u32 %s1285_s13, 3 }
  0x20   : > { %p1295_p0 = pnand %p853_p13, %p1259_p4  ;;  %s274_s17 = sand.u32 1, %s1179_s26  }
  0x21   : > { %s1468_s1 = sld [smem:[#allocation26_spill]]  ;;  %s278_s30 = scalar_lea.vmem [#allocation5], %s1288_s14 }
  0x22   : > { %s286_s8 = sshll.u32 %s278_s30, 4  ;;  %s1305_s29 = scalar_lea.sflag [#allocation6], %s274_s17  ;;  %s287_s8 = int_to_ptr.vmem [resolvable:$true] %s286_s8 }
  0x23   : > { %p799_p1 = scmp.ge.s32.totalorder %s1179_s26, 1  ;;  %p350_p2 = scmp.lt.s32.totalorder %s1179_s26, 3 }
  0x24   : > { %s1453_s7 = sshll.u32 %s1285_s13, 1  ;;  %s796_s18 = sshll.u32 %s1175_s25, 1 }
  0x25   : > { %p1313_p3 = pnand %p799_p1, %p350_p2  ;;  %s316_s19 = scalar_lea.vmem [#allocation8], %s1453_s7 }
  0x26   : > { %s1470_s3 = sld [smem:[#allocation27_spill]]  ;;  %s341_s12 = scalar_lea.hbm %s1443_s4, %s796_s18 }
  0x27   : > { %s282_s20 = scalar_lea.hbm %s1468_s1, %s1291_s15  ;;  %s313_s21 = scalar_lea.sflag [#allocation9], %s274_s17 }
  0x28   : > { %s284_s28 = sshll.u32 %s282_s20, 4  ;;  %s325_s20 = sshll.u32 %s316_s19, 4  ;;  %s285_s28 = int_to_ptr.hbm [resolvable:$true] %s284_s28  ;;  %s326_s20 = int_to_ptr.vmem [resolvable:$true] %s325_s20 }
  0x29   : > { %836 = dma.hbm_to_vmem [thread:$0]  (!%p1295_p0), %s285_s28, 128, %s287_s8, %s1305_s29  }
  0x2a   : > { %s263_s19 = scalar_lea.hbm %s1439_s0, %s1291_s15  ;;  %s258_s1 = scalar_lea.vmem [#allocation2], %s1288_s14 }
  0x2b   : > { %s267_s30 = sshll.u32 %s258_s1, 4  ;;  %s343_s7 = sshll.u32 %s341_s12, 4  ;;  %s268_s30 = int_to_ptr.vmem [resolvable:$true] %s267_s30  ;;  %s344_s7 = int_to_ptr.hbm [resolvable:$true] %s343_s7 }
  0x2c   : > { %s321_s23 = scalar_lea.hbm %s1470_s3, %s796_s18  ;;  %s265_s3 = sshll.u32 %s263_s19, 4  ;;  %s266_s3 = int_to_ptr.hbm [resolvable:$true] %s265_s3 }
  0x2d   : > { %s323_s28 = sshll.u32 %s321_s23, 4  ;;  %s255_s23 = scalar_lea.sflag [#allocation3], %s1285_s13  ;;  %s324_s28 = int_to_ptr.hbm [resolvable:$true] %s323_s28 }
  0x2e   : > { %842 = dma.hbm_to_vmem [thread:$0]  (!%p1295_p0), %s324_s28, 32, %s326_s20, %s313_s21  }
  0x2f   : > { %833 = dma.hbm_to_vmem [thread:$0]  (!%p1295_p0), %s266_s3, 128, %s268_s30, %s255_s23  }
  0x30   : > { %s301_s18 = scalar_lea.hbm %s1441_s2, %s1291_s15  ;;  %s297_s20 = scalar_lea.vmem [#allocation7], %s1288_s14 }
  0x31   : > { %s305_s28 = sshll.u32 %s297_s20, 4  ;;  %s303_s25 = sshll.u32 %s301_s18, 4  ;;  %s306_s28 = int_to_ptr.vmem [resolvable:$true] %s305_s28  ;;  %s304_s25 = int_to_ptr.hbm [resolvable:$true] %s303_s25 }
  0x32   : > { %839 = dma.hbm_to_vmem [thread:$0]  (!%p1295_p0), %s304_s25, 128, %s306_s28, %s1305_s29  }
  0x33   : > { %s1471_s8 = sshll.u32 %s1285_s13, 1  ;;  %354 = sbr.rel (%p1313_p3) target bundleno = 590 (0x24e), region = 40 }
  0x34   : > { %s336_s19 = scalar_lea.vmem [#allocation10], %s1471_s8  ;;  %s1351_s3 = sand.u32 (!%p1313_p3), 1, %s1163_s22  }
  0x35   : > { %s345_s1 = sshll.u32 %s336_s19, 4  ;;  %s1354_s14 = sshll.u32 (!%p1313_p3), %s1351_s3, 3  ;;  %s346_s1 = int_to_ptr.vmem [resolvable:$true] %s345_s1 }
  0x36   : > { %845 = dma.hbm_to_vmem [thread:$0]  (!%p1295_p0), %s344_s7, 32, %s346_s1, %s313_s21  }
  0x37   : > { %s357_s29 = scalar_lea.sflag (!%p1313_p3), [#allocation3], %s1351_s3  ;;  %s360_s12 = scalar_lea.vmem (!%p1313_p3), [#allocation2], %s1354_s14 }
  0x38   : > { %1138 = dma.done.wait (%p1267_p8), %s357_s29, 128  }
  0x39   : > { %1140 = vsyncadd (%p1267_p8), %s357_s29, 4294967168  ;;  %s366_s21 = sand.u32 1, %s1247_s27   ;;  %s370_s13 = scalar_lea.vmem [#allocation5], %s1354_s14 }
  0x3a   : > { %s367_s11 = scalar_lea.sflag [#allocation6], %s366_s21 }
  0x3b   : > { %1142 = dma.done.wait (%p1267_p8), %s367_s11, 256  }
  0x3c   : > { %1144 = vsyncadd (%p1267_p8), %s367_s11, 4294967040  ;;  %s803_s15 = sshll.u32 %s1351_s3, 1  ;;  %s380_s16 = scalar_lea.vmem [#allocation7], %s1354_s14 }
  0x3d   : > { %s387_s30 = scalar_lea.sflag [#allocation9], %s366_s21  ;;  %s390_s23 = scalar_lea.vmem [#allocation8], %s803_s15 }
  0x3e   : > { %1146 = dma.done.wait (%p1267_p8), %s387_s30, 64  }
  0x3f   : > { %1148 = vsyncadd (%p1267_p8), %s387_s30, 4294967232  ;;  %vm459_vm0 = vcmask 261120   ;;  %v457_v0 = vld [vmem:[%s370_s13] sm:$0xff]  ;;  %v455_v1 = vld [vmem:[%s360_s12] sm:$0xff]  ;;  %vm490_vm2 = vcmask 64512   ;;  %s400_s27 = scalar_lea.vmem [#allocation10], %s803_s15 }
  0x40   : > { %807 = vmatpush.xpose.msk.msra.mxu0 %vm459_vm0, %v457_v0  ;;  %v456_v2 = vmul.f32 0.17677669, %v455_v1  ;;  %v486_v3 = vld [vmem:[%s390_s23] sm:$0x3]  ;;  %v458_v13 = vld [vmem:[%s380_s16] sm:$0xff]  ;;  %s812_s9 = sshll.u32 %s1171_s24, 3 }
  0x41   : > { %v487_v4 = vunpack.c.0.s8 %v486_v3  ;;  %540 = vmatpush.msra.mxu1 %v458_v13  ;;  %v516_v21 = vld [vmem:[%s400_s27] sm:$0x3]  ;;  %s578_s18 = scalar_lea.hbm %s1445_s6, %s812_s9  ;;  %s454_s20 = scalar_lea.vmem [#allocation12], %s1354_s14 }
  0x42   : > { %v517_v24 = vunpack.c.0.s8 %v516_v21  ;;  %s580_s28 = sshll.u32 %s454_s20, 4  ;;  %s582_s25 = sshll.u32 %s578_s18, 4  ;;  %s581_s28 = int_to_ptr.vmem [resolvable:$true] %s580_s28  ;;  %s583_s25 = int_to_ptr.hbm [resolvable:$true] %s582_s25 }
  0x43   : > { %808 = vmatmul.msk.f32.vlgmr.msra.gmra.mxu0 %vm459_vm0, %v456_v2  ;;  %vm488_vm1 = vcmp.eq.s32.totalorder %v487_v4, 0  ;;  %s552_s7 = scalar_lea.sflag [#allocation13], %s1351_s3  ;;  %s1071_s8 = sshra.s32 %s583_s25, 4  ;;  %s1072_s8 = int_to_ptr.hbm [resolvable:$true] %s1071_s8 }
  0x44   : > { %vm518_vm7 = vcmp.ne.s32.totalorder %v517_v24, 0  ;;  %s1073_s24 = scalar_lea.hbm %s1072_s8, 8  ;;  %s1077_s29 = scalar_lea.hbm %s1445_s6, 16 }
  0x45   : > { %p1074_p4 = scmp.ne.s32.totalorder %s1072_s8, %s1073_s24  ;;  %p1078_p7 = scmp.lt.s32.totalorder %s1072_s8, %s1445_s6 }
  0x46   : > { %p1079_p8 = scmp.lt.s32.totalorder %s1077_s29, %s1073_s24 }
  0x47   : > { %p1075_p5 = pnand %p1074_p4, %p1271_p9 }
  0x48   : > { %p1080_p10 = por %p1079_p8, %p1078_p7 }
  0x49   : > { %p1076_p6 = pneg %p1075_p5 }
  0x4b   : > { %p1081_p13 = pnand %p1080_p10, %p1076_p6 }
  0xc0   : > { %v483_v5 = vpop.f32.mrf.mxu0 }
  0xc1   : > { %v489_v6 = vsel %vm488_vm1, -1e+30, %v483_v5 }
  0xc2   : > { %v491_v7 = vsel %vm490_vm2, %v489_v6, -inf }
  0xc3   : > { %492 = vmax.xlane.f32.xlu0 %v491_v7 }
 0x136   : > { %v493_v8 = vpop.xlane.xlu0 %492 }
 0x137   : > { %v494_v9 = vsub.f32 %v489_v6, %v493_v8 }
 0x139   : > { %v495_v10 = vmul.f32 1.442695, %v494_v9 }
 0x13b   : > { %903 = vpow2.f32 %v495_v10 }
 0x141   : > { %v904_v11 = vpop.eup %903 }
 0x142   : > { %v497_v12 = vsel %vm490_vm2, %v904_v11, 0.0 }
 0x143   : > { %498 = vadd.xlane.f32.xlu0 %v497_v12 }
 0x1b6   : > { %v499_v14 = vpop.xlane.xlu0 %498 }
 0x1b7   : > { %905 = vrcp.f32 %v499_v14  ;;  %v511_v18 = vand.u32 2147483648, %v499_v14  ;;  %v509_v20 = vand.u32 2147483647, %v499_v14  ;;  %vm505_vm4 = vweird.f32 %v499_v14 }
 0x1b9   : > { %v512_v23 = vor.u32 1.1754944e-38, %v511_v18  ;;  %vm510_vm6 = vcmp.eq.f32.partialorder %v509_v20, 8.507059e+37 }
 0x1bd   : > { %v906_v15 = vpop.eup %905 }
 0x1be   : > { %v501_v16 = vmul.f32 %v906_v15, %v499_v14  ;;  %vm506_vm3 = vweird.f32 %v906_v15 }
 0x1bf   : > { %vm507_vm5 = vmor %vm505_vm4, %vm506_vm3 }
 0x1c0   : > { %v502_v17 = vsub.f32 1.0, %v501_v16 }
 0x1c2   : > { %v503_v19 = vmul.f32 %v906_v15, %v502_v17 }
 0x1c4   : > { %v504_v22 = vadd.f32 %v906_v15, %v503_v19 }
 0x1c6   : > { %v508_v25 = vsel %vm507_vm5, %v906_v15, %v504_v22 }
 0x1c7   : > { %v513_v26 = vsel %vm510_vm6, %v512_v23, %v508_v25 }
 0x1c8   : > { %v515_v27 = vmul.f32 %v904_v11, %v513_v26 }
 0x1ca   : > { %v519_v28 = vmul.f32 1.25, %v515_v27 }
 0x1cc   : > { %v520_v29 = vsel %vm518_vm7, %v519_v28, 0.0 }
 0x1cd   : > { %809 = vmatmul.msk.f32.vlgmr.msra.gmra.mxu1 %vm490_vm2, %v520_v29  ;;  %521 = vst.msk [vmem:[%s454_s20] sm:$0xff] %vm490_vm2, %v520_v29 }
 0x1ce   : > { %1084 = shalt.err (!%p1081_p13)
}
 0x1cf   : > { %827 = dma.vmem_to_hbm [thread:$0]  (%p1271_p9), %s581_s28, 128, %s583_s25, %s552_s7  }
 0x1d0   : > { %s563_s15 = scalar_lea.hbm %s1444_s5, %s812_s9  ;;  %s447_s16 = scalar_lea.vmem [#allocation11], %s1354_s14 }
 0x1d1   : > { %s565_s30 = sshll.u32 %s447_s16, 4  ;;  %s567_s23 = sshll.u32 %s563_s15, 4  ;;  %s566_s30 = int_to_ptr.vmem [resolvable:$true] %s565_s30  ;;  %s568_s23 = int_to_ptr.hbm [resolvable:$true] %s567_s23 }
 0x1d2   : > { %s547_s27 = scalar_lea.sflag [#allocation4], %s1351_s3  ;;  %s1099_s26 = sshra.s32 %s568_s23, 4  ;;  %s1100_s26 = int_to_ptr.hbm [resolvable:$true] %s1099_s26 }
 0x1d3   : > { %s1101_s17 = scalar_lea.hbm %s1100_s26, 8  ;;  %s1105_s9 = scalar_lea.hbm %s1444_s5, 16 }
 0x1d4   : > { %p1102_p0 = scmp.ne.s32.totalorder %s1100_s26, %s1101_s17  ;;  %p1106_p3 = scmp.lt.s32.totalorder %s1100_s26, %s1444_s5 }
 0x1d5   : > { %p1107_p4 = scmp.lt.s32.totalorder %s1105_s9, %s1101_s17 }
 0x1d6   : > { %p1103_p1 = pnand %p1102_p0, %p1271_p9 }
 0x1d7   : > { %p1108_p5 = por %p1107_p4, %p1106_p3 }
 0x1d8   : > { %p1104_p2 = pneg %p1103_p1 }
 0x1da   : > { %p1109_p6 = pnand %p1108_p5, %p1104_p2 }
 0x24a   : > { %v542_v30 = vpop.f32.mrf.mxu1 }
 0x24b   : > { %545 = vst.msk [vmem:[%s447_s16] sm:$0xff] %vm459_vm0, %v542_v30 }
 0x24c   : > { %1112 = shalt.err (!%p1109_p6)
}
 0x24d   : > { %826 = dma.vmem_to_hbm [thread:$0]  (%p1271_p9), %s566_s30, 128, %s568_s23, %s547_s27  }
 0x24e PF: > { %s1472_s3 = sld [smem:[#allocation19_spill]]  ;;  %p847_p7 = pnand %p788_p12, %p1278_p11 }
 0x24f   : > { %s1474_s7 = sld [smem:[#allocation22_spill]] }
 0x250   : > { %p848_p8 = pneg %p847_p7 }
 0x254   : > { %s594_s8 = sand.u32 1, %s1472_s3  }
 0x255   : > { %s595_s24 = scalar_lea.sflag [#allocation4], %s594_s8 }
 0x256   : > { %1150 = dma.done.wait (%p848_p8), %s595_s24, 128  }
 0x257   : > { %1152 = vsyncadd (%p848_p8), %s595_s24, 4294967168  ;;  %s605_s19 = scalar_lea.sflag [#allocation13], %s594_s8 }
 0x258   : > { %1154 = dma.done.wait (%p848_p8), %s605_s19, 128  }
 0x259   : > { %1156 = vsyncadd (%p848_p8), %s605_s19, 4294967168  ;;  %s32_s26 = sadd.s32 1, %s1474_s7   ;;  %s1475_s10 = sld [smem:[#allocation20_spill]] }
 0x25a   : > { %p29_p10 = scmp.ge.s32.totalorder %s32_s26, 4   ;;  %s1476_s23 = sld [smem:[#allocation24_spill]] }
 0x25b   : > { %s1477_s24 = sld [smem:[#allocation21_spill]]  ;;  %s1479_s21 = smov %s1163_s22 }
 0x25c   : > { %s1478_s25 = sld [smem:[#allocation23_spill]]  ;;  %31 = sbr.rel (!%p29_p10) target bundleno = 15 (0xf), region = 150 }
 0x25f   : > { %s1480_s22 = smov %s1475_s10 }
 0x261   :  { %611 = vsyncpa [#allocation3], 1 }
 0x262   :  { %613 = vsyncpa [#allocation3 + $0x1], 1 }
 0x263   :  { %614 = vsyncpa [#allocation6], 1 }
 0x264   :  { %616 = vsyncpa [#allocation6 + $0x1], 1 }
 0x265   :  { %617 = vsyncpa [#allocation9], 1 }
 0x266   :  { %619 = vsyncpa [#allocation9 + $0x1], 1 }
 0x267   :  { %620 = vsyncpa [#allocation4], 1 }
 0x268   :  { %622 = vsyncpa [#allocation4 + $0x1], 1 }
 0x269   :  { %623 = vsyncpa [#allocation13], 1 }
 0x26a   :  { %625 = vsyncpa [#allocation13 + $0x1], 1 }

</bundles_post_ra>
